<compile_context>
chip_gen: v5e
topology: v5e:2x2
jax: 0.10.0
libtpu: 0.0.40
codegen_flags: <defaults>
</compile_context>

<pallas_src>
from functools import partial

import jax
import jax.numpy as jnp
from jax.experimental import pallas as pl
from jax.experimental.pallas import tpu as pltpu


# --------------------------- Pallas kernel ----------------------------------

def _rmsnorm_kernel(x_ref, w_ref, o_ref, *, eps):
    # x_ref: (TM, D) tile, w_ref: (1, D), o_ref: (TM, D)
    x = x_ref[...].astype(jnp.float32)
    # Matches the torch module exactly: weight * x / (||x||_2 + eps)
    # (L2 norm of the row, eps added OUTSIDE the sqrt — not standard RMSNorm.)
    norm = jnp.sqrt(jnp.sum(x * x, axis=-1, keepdims=True))
    inv = pl.reciprocal(norm + eps, approx=True)      # EUP slot, not VALU divide
    w = w_ref[...].astype(jnp.float32)
    o_ref[...] = ((x * inv) * w).astype(o_ref.dtype)


def rmsnorm(x, weight, eps=1e-6, block_rows=512):
    """RMSNorm over the last axis of x. x: (..., D), weight: (D,)."""
    orig_shape = x.shape
    D = orig_shape[-1]
    x2d = x.reshape(-1, D)
    M = x2d.shape[0]

    if M <= block_rows:
        # Single block along rows; block == full dim so no (8,128) issue.
        tm = M
        m_padded = M
    else:
        tm = block_rows                       # multiple of 8 (sublane-aligned)
        m_padded = pl.cdiv(M, tm) * tm
        if m_padded != M:
            # Pad with zeros; padded rows give norm=0 -> 1/eps, harmless and
            # sliced away below.
            x2d = jnp.pad(x2d, ((0, m_padded - M), (0, 0)))

    grid = (m_padded // tm,)

    out = pl.pallas_call(
        partial(_rmsnorm_kernel, eps=eps),
        grid=grid,
        in_specs=[
            pl.BlockSpec((tm, D), lambda i: (i, 0)),   # x rows, pipelined
            pl.BlockSpec((1, D), lambda i: (0, 0)),    # weight, broadcast
        ],
        out_specs=pl.BlockSpec((tm, D), lambda i: (i, 0)),
        out_shape=jax.ShapeDtypeStruct((m_padded, D), x.dtype),
        compiler_params=pltpu.CompilerParams(
            dimension_semantics=("parallel",)),        # shard rows across TCs
    )(x2d, weight.reshape(1, D))

    if m_padded != M:
        out = out[:M]
    return out.reshape(orig_shape)


# ----------------------------- reference ------------------------------------

def rmsnorm_ref(x, weight, eps=1e-6):
    xf = x.astype(jnp.float32)
    norm = jnp.sqrt(jnp.sum(xf * xf, axis=-1, keepdims=True))
    return (weight.astype(jnp.float32) * xf / (norm + eps)).astype(x.dtype)


# ------------------------------- driver --------------------------------------

if __name__ == "__main__":
    key = jax.random.PRNGKey(0)
    kx, kw, kx2 = jax.random.split(key, 3)

    # Small shapes consistent with the module: (batch=2, seq=8, dim=128).
    B, T, D = 2, 8, 128
    x = jax.random.normal(kx, (B, T, D), jnp.float32)
    weight = 1.0 + 0.1 * jax.random.normal(kw, (D,), jnp.float32)

    out = rmsnorm(x, weight)
    out = jax.block_until_ready(out)
    assert out.shape == x.shape
    err = float(jnp.max(jnp.abs(out - rmsnorm_ref(x, weight))))
    assert err < 2e-3, f"max abs error (small case): {err}"

    # Second case exercising the multi-block pipelined path + row padding
    # (M = 4*300 = 1200 rows -> 3 blocks of 512 with padding).
    x_big = jax.random.normal(kx2, (4, 300, D), jnp.float32)
    out_big = jax.block_until_ready(rmsnorm(x_big, weight))
    err_big = float(jnp.max(jnp.abs(out_big - rmsnorm_ref(x_big, weight))))
    assert err_big < 2e-3, f"max abs error (tiled case): {err_big}"

    print("KERNEL_OK")
</pallas_src>

<mosaic_0001>
module attributes {stable_mosaic.version = 11 : i64} {
  func.func @_rmsnorm_kernel(%arg0: i32, %arg1: memref<16x128xf32, #tpu.memory_space<vmem>>, %arg2: memref<1x128xf32, #tpu.memory_space<vmem>>, %arg3: memref<16x128xf32, #tpu.memory_space<vmem>>) attributes {dimension_semantics = [#tpu.dimension_semantics<parallel>], iteration_bounds = array<i64: 1>, scalar_prefetch = 0 : i64, scratch_operands = 0 : i64, tpu.core_type = #tpu.core_type<tc>, window_params = [{transform_indices = @transform_0, window_bounds = array<i64: 16, 128>}, {pipeline_mode = #tpu.pipeline_mode<synchronous>, transform_indices = @transform_1, window_bounds = array<i64: 1, 128>}, {transform_indices = @transform_2, window_bounds = array<i64: 16, 128>}]} {
    %c0 = arith.constant 0 : index
    %c0_0 = arith.constant 0 : index
    %0 = vector.load %arg1[%c0, %c0_0] : memref<16x128xf32, #tpu.memory_space<vmem>>, vector<16x128xf32>
    %1 = arith.mulf %0, %0 : vector<16x128xf32>
    %cst = arith.constant dense<0.000000e+00> : vector<16xf32>
    %2 = vector.multi_reduction <add>, %1, %cst [1] : vector<16x128xf32> to vector<16xf32>
    %3 = vector.shape_cast %2 : vector<16xf32> to vector<16x1xf32>
    %4 = math.sqrt %3 : vector<16x1xf32>
    %cst_1 = arith.constant 9.99999997E-7 : f32
    %5 = vector.broadcast %cst_1 : f32 to vector<16x1xf32>
    %6 = arith.addf %4, %5 : vector<16x1xf32>
    %7 = tpu.reciprocal %6 {approx = true} : vector<16x1xf32> -> vector<16x1xf32>
    %c0_2 = arith.constant 0 : index
    %c0_3 = arith.constant 0 : index
    %8 = vector.load %arg2[%c0_2, %c0_3] : memref<1x128xf32, #tpu.memory_space<vmem>>, vector<1x128xf32>
    %9 = vector.broadcast %7 : vector<16x1xf32> to vector<16x128xf32>
    %10 = arith.mulf %0, %9 : vector<16x128xf32>
    %11 = vector.broadcast %8 : vector<1x128xf32> to vector<16x128xf32>
    %12 = arith.mulf %10, %11 : vector<16x128xf32>
    %c0_4 = arith.constant 0 : index
    %c0_5 = arith.constant 0 : index
    %13 = vector.load %arg3[%c0_4, %c0_5] : memref<16x128xf32, #tpu.memory_space<vmem>>, vector<16x128xf32>
    tpu.vector_store %arg3[%c0_4, %c0_5], %12 {strides = array<i32>} : memref<16x128xf32, #tpu.memory_space<vmem>>, vector<16x128xf32>,
    return
  }
  func.func @transform_0(%arg0: i32) -> (i32, i32) {
    %c0_i32 = arith.constant 0 : i32
    %c0_i32_0 = arith.constant 0 : i32
    return %arg0, %c0_i32 : i32, i32
  }
  func.func @transform_1(%arg0: i32) -> (i32, i32) {
    %c0_i32 = arith.constant 0 : i32
    %c0_i32_0 = arith.constant 0 : i32
    %c0_i32_1 = arith.constant 0 : i32
    return %c0_i32, %c0_i32_0 : i32, i32
  }
  func.func @transform_2(%arg0: i32) -> (i32, i32) {
    %c0_i32 = arith.constant 0 : i32
    %c0_i32_0 = arith.constant 0 : i32
    return %arg0, %c0_i32 : i32, i32
  }
}

</mosaic_0001>

<bundles_post_ra>
// kernel: tpu_custom_call.1
= control target key start
LH: loop header
LB: loop body
LE: loop exit
PB: predicated region body
PF: predicated region fallthrough
CT: control target
= control target key end

     0   :  { %7 = vsyncpa [#allocation3], 0  ;;  %s235_s0 = inlined_call_operand.hbm [shape: f32[16,128], index: 0, kind: input, shape index: {}]   ;;  %s236_s1 = inlined_call_operand.hbm [shape: f32[1,128], index: 1, kind: input, shape index: {}]   ;;  %s237_s2 = inlined_call_operand.hbm [shape: f32[16,128], index: 2, kind: output, shape index: {}]  }
   0x1   :  { %8 = vsyncpa [#allocation6], 0 }
   0x2   :  { %9 = vsyncpa [#allocation4], 0  ;;  %s14_s11 = sshll.u32 %s235_s0, 4  ;;  %s200_s12 = smov [#allocation2]   ;;  %s15_s11 = int_to_ptr.hbm [resolvable:$true] %s14_s11 }
   0x3   :  { %s16_s13 = sshll.u32 %s200_s12, 4  ;;  %s28_s16 = sshll.u32 %s236_s1, 4  ;;  %s17_s13 = int_to_ptr.vmem [resolvable:$true] %s16_s13  ;;  %s29_s16 = int_to_ptr.hbm [resolvable:$true] %s28_s16 }
   0x4   :  { %s201_s17 = smov 128   ;;  %s202_s18 = smov 8  }
   0x5   :  { %22 = dma.hbm_to_vmem [thread:$0]  %s15_s11, 256, %s17_s13, [#allocation3], %s201_s17, %s201_s17, %s202_s18  }
   0x6   :  { %s203_s19 = smov [#allocation5]  }
   0x7   :  { %s30_s20 = sshll.u32 %s203_s19, 4  ;;  %s31_s20 = int_to_ptr.vmem [resolvable:$true] %s30_s20 }
   0x8   :  { %33 = dma.hbm_to_vmem [thread:$0]  %s29_s16, 16, %s31_s20, [#allocation6]  }
   0x9   :  { %194 = dma.done.wait [#allocation3], 256  }
   0xa   :  { %195 = vsyncadd [#allocation3], 4294967040 }
   0xb   :  { %196 = dma.done.wait [#allocation6], 16  }
   0xc   :  { %197 = vsyncadd [#allocation6], 4294967280  ;;  %v42_v0 = vld [vmem:[#allocation2] sm:$0xff]  ;;  %v43_v2 = vld [vmem:[#allocation2 + $0x8] sm:$0xff]  ;;  %s204_s0 = smov [#allocation7]   ;;  %s94_s23 = sshll.u32 %s237_s2, 4  ;;  %s95_s23 = int_to_ptr.hbm [resolvable:$true] %s94_s23 }
   0xd   :  { %v44_v1 = vmul.f32 %v42_v0, %v42_v0  ;;  %v45_v3 = vmul.f32 %v43_v2, %v43_v2  ;;  %v113_v27 = vld [vmem:[#allocation5] ss:$0 sm:$0xff]  ;;  %s92_s1 = sshll.u32 %s204_s0, 4  ;;  %s93_s1 = int_to_ptr.vmem [resolvable:$true] %s92_s1 }
   0xf   :  { %46 = vadd.xlane.f32.xlu0 %v44_v1 }
  0x17   :  { %48 = vadd.xlane.f32.xlu0 %v45_v3 }
  0x82   :  { %v47_v4 = vpop.xlane.xlu0 %46 }
  0x83   :  { %114 = vrsqrt.f32 %v47_v4  ;;  %vm57_vm0 = vcmp.eq.f32.partialorder %v47_v4, inf  ;;  %v60_v16 = vand.u32 2147483648, %v47_v4  ;;  %vm59_vm1 = vcmp.eq.f32.partialorder %v47_v4, 0.0 }
  0x89   :  { %v115_v5 = vpop.eup %114 }
  0x8a   :  { %v51_v6 = vmul.f32 %v115_v5, %v47_v4  ;;  %v49_v7 = vpop.xlane.xlu0 %48 }
  0x8b   :  { %116 = vrsqrt.f32 %v49_v7  ;;  %vm69_vm2 = vcmp.eq.f32.partialorder %v49_v7, inf  ;;  %v72_v24 = vand.u32 2147483648, %v49_v7  ;;  %vm71_vm3 = vcmp.eq.f32.partialorder %v49_v7, 0.0 }
  0x8c   :  { %v52_v8 = vmul.f32 %v115_v5, %v51_v6 }
  0x8e   :  { %v53_v9 = vmul.f32 0.5, %v52_v8 }
  0x90   :  { %v54_v10 = vsub.f32 1.5, %v53_v9 }
  0x91   :  { %v117_v11 = vpop.eup %116 }
  0x92   :  { %v55_v12 = vmul.f32 %v115_v5, %v54_v10  ;;  %v63_v13 = vmul.f32 %v117_v11, %v49_v7 }
  0x94   :  { %v56_v14 = vmul.f32 %v55_v12, %v47_v4  ;;  %v64_v15 = vmul.f32 %v117_v11, %v63_v13 }
  0x96   :  { %v58_v17 = vsel %vm57_vm0, %v47_v4, %v56_v14  ;;  %v65_v18 = vmul.f32 0.5, %v64_v15 }
  0x97   :  { %v61_v19 = vsel %vm59_vm1, %v60_v16, %v58_v17 }
  0x98   :  { %v66_v20 = vsub.f32 1.5, %v65_v18  ;;  %v74_v21 = vadd.f32 1e-06, %v61_v19 }
  0x9a   :  { %v67_v22 = vmul.f32 %v117_v11, %v66_v20  ;;  %118 = vrcp.f32 %v74_v21 }
  0x9c   :  { %v68_v23 = vmul.f32 %v67_v22, %v49_v7 }
  0x9e   :  { %v70_v25 = vsel %vm69_vm2, %v49_v7, %v68_v23 }
  0x9f   :  { %v73_v26 = vsel %vm71_vm3, %v72_v24, %v70_v25 }
  0xa0   :  { %v119_v28 = vpop.eup %118  ;;  %v75_v29 = vadd.f32 1e-06, %v73_v26 }
  0xa1   :  { %v79_v30 = vmul.f32 %v119_v28, %v42_v0 }
  0xa2   :  { %120 = vrcp.f32 %v75_v29 }
  0xa3   :  { %v84_v31 = vmul.f32 %v113_v27, %v79_v30 }
  0xa5   :  { %86 = vst [vmem:[#allocation7] sm:$0xff] %v84_v31 }
  0xa8   :  { %v121_v32 = vpop.eup %120 }
  0xa9   :  { %v80_v33 = vmul.f32 %v121_v32, %v43_v2 }
  0xab   :  { %v85_v34 = vmul.f32 %v113_v27, %v80_v33 }
  0xad   :  { %87 = vst [vmem:[#allocation7 + $0x8] sm:$0xff] %v85_v34 }
  0xae   :  { %100 = dma.vmem_to_hbm [thread:$0]  %s93_s1, 256, %s95_s23, [#allocation4], %s201_s17, %s201_s17, %s202_s18  }
  0xaf   :  { %198 = dma.done.wait [#allocation4], 256  }
  0xb0   :  { %199 = vsyncadd [#allocation4], 4294967040 }
  0xb1   :  { %105 = vsyncpa [#allocation3], 1 }
  0xb2   :  { %106 = vsyncpa [#allocation6], 1 }
  0xb3   :  { %107 = vsyncpa [#allocation4], 1 }

</bundles_post_ra>
